<compile_context>
chip_gen: v7x
topology: tpu7x:2x2x1
jax: 0.10.0
libtpu: 0.0.40
codegen_flags: <defaults>
</compile_context>

<pallas_src>
import jax
import jax.numpy as jnp
import numpy as np
from jax.experimental import pallas as pl
from jax.experimental.pallas import tpu as pltpu

NEG_SLOPE = 0.1  # LeakyReLU negative slope used by the module

# Tap order (dy, dx) for the 3x3 kernel; t = (dy+1)*3 + (dx+1).
_TAPS = tuple((dy, dx) for dy in (-1, 0, 1) for dx in (-1, 0, 1))


def _make_fused_kernel(H, W, n_lanes, couts):
    """Fused multi-sublayer kernel for a fixed geometry / channel plan.

    The resident activation x has shape (cin, n_lanes): the lane axis is the whole
    batch (N images, each H*W flat, image-major).  Per sublayer:
        x9 = concat([mask_t * roll(x, -(dy*W+dx))  for the 9 taps] + [ones_row])
        z  = Wb @ x9         # Wb = (cout, 9*cin+1): BN-folded weights + bias column
        x  = leaky_relu(z)
    """
    n_layers = len(couts)

    def kernel(x_ref, mask_ref, *rest):
        o_ref = rest[-1]
        w_refs = rest[:-1]

        x = x_ref[...].astype(jnp.float32)            # (cin0, NL)
        masks = mask_ref[...]                         # (9, NL)  0/1 f32
        ones_row = jnp.ones((1, n_lanes), jnp.float32)

        for li in range(n_layers):
            pieces = []
            for t, (dy, dx) in enumerate(_TAPS):
                off = dy * W + dx                     # flat-index offset of the tap
                shift = (-off) % n_lanes              # lane j ends up holding x[j+off]
                rolled = x if shift == 0 else pltpu.roll(x, shift=shift, axis=1)
                if off == 0:
                    pieces.append(rolled)             # center tap is always valid
                else:
                    # zero positions whose neighbor is outside the image ('same'
                    # padding); also kills any cross-image / wrap-around lanes.
                    pieces.append(rolled * masks[t:t + 1, :])
            pieces.append(ones_row)                   # bias applied by the MXU
            x9 = jnp.concatenate(pieces, axis=0)      # (9*cin+1, NL)

            z = jnp.dot(w_refs[li][...], x9,
                        preferred_element_type=jnp.float32)   # (cout, NL)
            x = jnp.where(z > 0, z, NEG_SLOPE * z)    # LeakyReLU(0.1)
            # TODO(synk): training-mode BatchNorm (batch statistics) and stochastic
            # Dropout are not implemented; eval-mode semantics are used instead.

        o_ref[...] = x.astype(o_ref.dtype)

    return kernel


def erp_dec_layer_forward(x_nchw, params):
    """Full ERPDecLayer forward (eval mode). Input/output are NCHW like PyTorch."""
    N, cin0, H, W = x_nchw.shape
    HW = H * W
    NL = N * HW
    # Lane-dense layout requirement: whole batch sits on the 128-lane axis.
    assert NL % 128 == 0, (
        f"N*H*W = {NL} must be a multiple of 128 for the lane-dense layout")

    couts = tuple(int(p["w"].shape[-1]) for p in params)
    cout_last = couts[-1]

    # NCHW -> (C, N*H*W): channels on sublanes, whole batch on the lane axis.
    x_lanes = jnp.transpose(x_nchw, (1, 0, 2, 3)).reshape(cin0, NL)

    # 'same'-padding validity masks for the 9 taps, built once on the host and
    # tiled across the N images (9*NL floats total).  Cross-image contamination
    # from lane rolls only lands on positions these masks already zero.
    j = np.arange(HW)
    h, w = j // W, j % W
    mask_np = np.empty((9, HW), np.float32)
    for t, (dy, dx) in enumerate(_TAPS):
        mask_np[t] = ((h + dy >= 0) & (h + dy < H) &
                      (w + dx >= 0) & (w + dx < W)).astype(np.float32)
    masks = jnp.asarray(np.tile(mask_np, (1, N)))      # (9, NL)

    inputs = [x_lanes, masks]
    in_specs = [pl.BlockSpec((cin0, NL), lambda i: (0, 0)),
                pl.BlockSpec((9, NL), lambda i: (0, 0))]

    for p in params:
        kh, kw, cin, cout = p["w"].shape
        # Fold the inference-BN scale into the conv weights (host side).
        wfold = p["w"] * p["scale"][None, None, None, :]          # HWIO * (cout,)
        # HWIO -> tap-major (cout, 9*cin); append the fused bias as a last column
        # so the same MXU matmul applies it via the ones-row of x9.
        wmat = jnp.transpose(wfold, (3, 0, 1, 2)).reshape(cout, kh * kw * cin)
        wb = jnp.concatenate([wmat, p["bias"][:, None]], axis=1).astype(jnp.float32)
        inputs.append(wb)
        in_specs.append(pl.BlockSpec((cout, kh * kw * cin + 1), lambda i: (0, 0)))

    kernel = _make_fused_kernel(H, W, NL, couts)
    out = pl.pallas_call(
        kernel,
        out_shape=jax.ShapeDtypeStruct((cout_last, NL), x_nchw.dtype),
        grid_spec=pltpu.PrefetchScalarGridSpec(
            num_scalar_prefetch=0,
            grid=(1,),                                 # single step: no loop overhead
            in_specs=in_specs,
            out_specs=pl.BlockSpec((cout_last, NL), lambda i: (0, 0)),
        ),
        compiler_params=pltpu.CompilerParams(
            dimension_semantics=("arbitrary",)),
    )(*inputs)

    # (C, N*H*W) -> NCHW (tiny wrapper-side transpose)
    return jnp.transpose(out.reshape(cout_last, N, H, W), (1, 0, 2, 3))


def init_params(key, in_channels, conv_size, conv_sublayers):
    """Deterministic synthetic parameters for every sublayer.

    Channel plan of the module:
      i == 0 : in_channels    -> conv_size
      i == 1 : conv_size      -> conv_size // 2
      i >= 2 : conv_size // 2 -> conv_size // 2
    BatchNorm (eval) + conv bias are folded into per-channel (scale, bias).
    """
    half = conv_size // 2
    eps = 1e-5
    params = []
    cin = in_channels
    for i in range(conv_sublayers):
        cout = conv_size if i == 0 else half
        key, k1, k2, k3, k4 = jax.random.split(key, 5)
        w = 0.1 * jax.random.normal(k1, (3, 3, cin, cout), jnp.float32)   # HWIO
        conv_b = 0.1 * jax.random.normal(k2, (cout,), jnp.float32)
        gamma = 1.0 + 0.1 * jax.random.normal(k3, (cout,), jnp.float32)
        beta = 0.1 * jax.random.normal(k4, (cout,), jnp.float32)
        running_mean = jnp.zeros((cout,), jnp.float32)   # fresh-init BN stats
        running_var = jnp.ones((cout,), jnp.float32)
        bn_scale = gamma * jax.lax.rsqrt(running_var + eps)
        scale = bn_scale
        bias = (conv_b - running_mean) * bn_scale + beta
        params.append(dict(w=w, scale=scale, bias=bias))
        cin = cout
    return params


def reference_forward(x_nchw, params):
    """Plain-JAX reference (XLA conv) for correctness checking."""
    x = x_nchw
    for p in params:
        w_oihw = jnp.transpose(p["w"], (3, 2, 0, 1))
        y = jax.lax.conv_general_dilated(
            x, w_oihw, window_strides=(1, 1), padding="SAME",
            dimension_numbers=("NCHW", "OIHW", "NCHW"))
        y = y * p["scale"][None, :, None, None] + p["bias"][None, :, None, None]
        x = jnp.where(y > 0, y, NEG_SLOPE * y)
    return x


if __name__ == "__main__":
    key = jax.random.PRNGKey(0)
    kx, kp = jax.random.split(key)

    # Shapes consistent with ERPDecLayer(in_channels=4, conv_size=16,
    # conv_sublayers=3, conv_kernel_size=3, dense_size=32, dropoutRate=0.25);
    # input is NCHW with N*H*W a multiple of 128 (lane-dense).
    N, Cin, H, W = 2, 4, 8, 16
    conv_size, conv_sublayers = 16, 3

    x = jax.random.normal(kx, (N, Cin, H, W), jnp.float32)
    params = init_params(kp, Cin, conv_size, conv_sublayers)

    out = erp_dec_layer_forward(x, params)
    out = jax.block_until_ready(out)

    assert out.shape == (N, conv_size // 2, H, W), out.shape
    ref = reference_forward(x, params)
    np.testing.assert_allclose(np.asarray(out), np.asarray(ref),
                               rtol=1e-4, atol=1e-4)
    print("KERNEL_OK")
</pallas_src>

<mosaic_0001>
module attributes {stable_mosaic.version = 11 : i64} {
  func.func @kernel(%arg0: i32, %arg1: memref<4x256xf32, #tpu.memory_space<vmem>>, %arg2: memref<9x256xf32, #tpu.memory_space<vmem>>, %arg3: memref<16x37xf32, #tpu.memory_space<vmem>>, %arg4: memref<8x145xf32, #tpu.memory_space<vmem>>, %arg5: memref<8x73xf32, #tpu.memory_space<vmem>>, %arg6: memref<8x256xf32, #tpu.memory_space<vmem>>) attributes {dimension_semantics = [#tpu.dimension_semantics<arbitrary>], iteration_bounds = array<i64: 1>, scalar_prefetch = 0 : i64, scratch_operands = 0 : i64, tpu.core_type = #tpu.core_type<tc>, window_params = [{pipeline_mode = #tpu.pipeline_mode<synchronous>, transform_indices = @transform_0, window_bounds = array<i64: 4, 256>}, {pipeline_mode = #tpu.pipeline_mode<synchronous>, transform_indices = @transform_1, window_bounds = array<i64: 9, 256>}, {pipeline_mode = #tpu.pipeline_mode<synchronous>, transform_indices = @transform_2, window_bounds = array<i64: 16, 37>}, {pipeline_mode = #tpu.pipeline_mode<synchronous>, transform_indices = @transform_3, window_bounds = array<i64: 8, 145>}, {pipeline_mode = #tpu.pipeline_mode<synchronous>, transform_indices = @transform_4, window_bounds = array<i64: 8, 73>}, {pipeline_mode = #tpu.pipeline_mode<synchronous>, transform_indices = @transform_5, window_bounds = array<i64: 8, 256>}]} {
    %c0 = arith.constant 0 : index
    %c0_0 = arith.constant 0 : index
    %0 = vector.load %arg1[%c0, %c0_0] : memref<4x256xf32, #tpu.memory_space<vmem>>, vector<4x256xf32>
    %c0_1 = arith.constant 0 : index
    %c0_2 = arith.constant 0 : index
    %1 = vector.load %arg2[%c0_1, %c0_2] : memref<9x256xf32, #tpu.memory_space<vmem>>, vector<9x256xf32>
    %cst = arith.constant 1.000000e+00 : f32
    %2 = vector.broadcast %cst : f32 to vector<1x256xf32>
    %c17_i32 = arith.constant 17 : i32
    %3 = tpu.dynamic_rotate %0 by %c17_i32 dim 1 : vector<4x256xf32>, i32 -> vector<4x256xf32>
    %4 = vector.extract_strided_slice %1 {offsets = [0, 0], sizes = [1, 256], strides = [1, 1]} : vector<9x256xf32> to vector<1x256xf32>
    %5 = vector.broadcast %4 : vector<1x256xf32> to vector<4x256xf32>
    %6 = arith.mulf %3, %5 : vector<4x256xf32>
    %c16_i32 = arith.constant 16 : i32
    %7 = tpu.dynamic_rotate %0 by %c16_i32 dim 1 : vector<4x256xf32>, i32 -> vector<4x256xf32>
    %8 = vector.extract_strided_slice %1 {offsets = [1, 0], sizes = [1, 256], strides = [1, 1]} : vector<9x256xf32> to vector<1x256xf32>
    %9 = vector.broadcast %8 : vector<1x256xf32> to vector<4x256xf32>
    %10 = arith.mulf %7, %9 : vector<4x256xf32>
    %c15_i32 = arith.constant 15 : i32
    %11 = tpu.dynamic_rotate %0 by %c15_i32 dim 1 : vector<4x256xf32>, i32 -> vector<4x256xf32>
    %12 = vector.extract_strided_slice %1 {offsets = [2, 0], sizes = [1, 256], strides = [1, 1]} : vector<9x256xf32> to vector<1x256xf32>
    %13 = vector.broadcast %12 : vector<1x256xf32> to vector<4x256xf32>
    %14 = arith.mulf %11, %13 : vector<4x256xf32>
    %c1_i32 = arith.constant 1 : i32
    %15 = tpu.dynamic_rotate %0 by %c1_i32 dim 1 : vector<4x256xf32>, i32 -> vector<4x256xf32>
    %16 = vector.extract_strided_slice %1 {offsets = [3, 0], sizes = [1, 256], strides = [1, 1]} : vector<9x256xf32> to vector<1x256xf32>
    %17 = vector.broadcast %16 : vector<1x256xf32> to vector<4x256xf32>
    %18 = arith.mulf %15, %17 : vector<4x256xf32>
    %c255_i32 = arith.constant 255 : i32
    %19 = tpu.dynamic_rotate %0 by %c255_i32 dim 1 : vector<4x256xf32>, i32 -> vector<4x256xf32>
    %20 = vector.extract_strided_slice %1 {offsets = [5, 0], sizes = [1, 256], strides = [1, 1]} : vector<9x256xf32> to vector<1x256xf32>
    %21 = vector.broadcast %20 : vector<1x256xf32> to vector<4x256xf32>
    %22 = arith.mulf %19, %21 : vector<4x256xf32>
    %c241_i32 = arith.constant 241 : i32
    %23 = tpu.dynamic_rotate %0 by %c241_i32 dim 1 : vector<4x256xf32>, i32 -> vector<4x256xf32>
    %24 = vector.extract_strided_slice %1 {offsets = [6, 0], sizes = [1, 256], strides = [1, 1]} : vector<9x256xf32> to vector<1x256xf32>
    %25 = vector.broadcast %24 : vector<1x256xf32> to vector<4x256xf32>
    %26 = arith.mulf %23, %25 : vector<4x256xf32>
    %c240_i32 = arith.constant 240 : i32
    %27 = tpu.dynamic_rotate %0 by %c240_i32 dim 1 : vector<4x256xf32>, i32 -> vector<4x256xf32>
    %28 = vector.extract_strided_slice %1 {offsets = [7, 0], sizes = [1, 256], strides = [1, 1]} : vector<9x256xf32> to vector<1x256xf32>
    %29 = vector.broadcast %28 : vector<1x256xf32> to vector<4x256xf32>
    %30 = arith.mulf %27, %29 : vector<4x256xf32>
    %c239_i32 = arith.constant 239 : i32
    %31 = tpu.dynamic_rotate %0 by %c239_i32 dim 1 : vector<4x256xf32>, i32 -> vector<4x256xf32>
    %32 = vector.extract_strided_slice %1 {offsets = [8, 0], sizes = [1, 256], strides = [1, 1]} : vector<9x256xf32> to vector<1x256xf32>
    %33 = vector.broadcast %32 : vector<1x256xf32> to vector<4x256xf32>
    %34 = arith.mulf %31, %33 : vector<4x256xf32>
    %35 = tpu.concatenate %6, %10, %14, %18, %0, %22, %26, %30, %34, %2 in 0 : vector<4x256xf32>, vector<4x256xf32>, vector<4x256xf32>, vector<4x256xf32>, vector<4x256xf32>, vector<4x256xf32>, vector<4x256xf32>, vector<4x256xf32>, vector<4x256xf32>, vector<1x256xf32> -> vector<37x256xf32>
    %c0_3 = arith.constant 0 : index
    %c0_4 = arith.constant 0 : index
    %36 = vector.load %arg3[%c0_3, %c0_4] : memref<16x37xf32, #tpu.memory_space<vmem>>, vector<16x37xf32>
    %cst_5 = arith.constant dense<0.000000e+00> : vector<16x256xf32>
    %37 = tpu.matmul %36, %35, %cst_5 {dimension_numbers = #tpu.dot_dimension_numbers<[1], [0], [0], [1], [0, 0, 1, 1], [], []>} : vector<16x37xf32>, vector<37x256xf32>, vector<16x256xf32> -> vector<16x256xf32>
    %cst_6 = arith.constant 0.000000e+00 : f32
    %38 = vector.broadcast %cst_6 : f32 to vector<16x256xf32>
    %39 = arith.cmpf ogt, %37, %38 : vector<16x256xf32>
    %cst_7 = arith.constant 1.000000e-01 : f32
    %40 = vector.broadcast %cst_7 : f32 to vector<16x256xf32>
    %41 = arith.mulf %40, %37 : vector<16x256xf32>
    %42 = arith.select %39, %37, %41 : vector<16x256xi1>, vector<16x256xf32>
    %c17_i32_8 = arith.constant 17 : i32
    %43 = tpu.dynamic_rotate %42 by %c17_i32_8 dim 1 : vector<16x256xf32>, i32 -> vector<16x256xf32>
    %44 = vector.extract_strided_slice %1 {offsets = [0, 0], sizes = [1, 256], strides = [1, 1]} : vector<9x256xf32> to vector<1x256xf32>
    %45 = vector.broadcast %44 : vector<1x256xf32> to vector<16x256xf32>
    %46 = arith.mulf %43, %45 : vector<16x256xf32>
    %c16_i32_9 = arith.constant 16 : i32
    %47 = tpu.dynamic_rotate %42 by %c16_i32_9 dim 1 : vector<16x256xf32>, i32 -> vector<16x256xf32>
    %48 = vector.extract_strided_slice %1 {offsets = [1, 0], sizes = [1, 256], strides = [1, 1]} : vector<9x256xf32> to vector<1x256xf32>
    %49 = vector.broadcast %48 : vector<1x256xf32> to vector<16x256xf32>
    %50 = arith.mulf %47, %49 : vector<16x256xf32>
    %c15_i32_10 = arith.constant 15 : i32
    %51 = tpu.dynamic_rotate %42 by %c15_i32_10 dim 1 : vector<16x256xf32>, i32 -> vector<16x256xf32>
    %52 = vector.extract_strided_slice %1 {offsets = [2, 0], sizes = [1, 256], strides = [1, 1]} : vector<9x256xf32> to vector<1x256xf32>
    %53 = vector.broadcast %52 : vector<1x256xf32> to vector<16x256xf32>
    %54 = arith.mulf %51, %53 : vector<16x256xf32>
    %c1_i32_11 = arith.constant 1 : i32
    %55 = tpu.dynamic_rotate %42 by %c1_i32_11 dim 1 : vector<16x256xf32>, i32 -> vector<16x256xf32>
    %56 = vector.extract_strided_slice %1 {offsets = [3, 0], sizes = [1, 256], strides = [1, 1]} : vector<9x256xf32> to vector<1x256xf32>
    %57 = vector.broadcast %56 : vector<1x256xf32> to vector<16x256xf32>
    %58 = arith.mulf %55, %57 : vector<16x256xf32>
    %c255_i32_12 = arith.constant 255 : i32
    %59 = tpu.dynamic_rotate %42 by %c255_i32_12 dim 1 : vector<16x256xf32>, i32 -> vector<16x256xf32>
    %60 = vector.extract_strided_slice %1 {offsets = [5, 0], sizes = [1, 256], strides = [1, 1]} : vector<9x256xf32> to vector<1x256xf32>
    %61 = vector.broadcast %60 : vector<1x256xf32> to vector<16x256xf32>
    %62 = arith.mulf %59, %61 : vector<16x256xf32>
    %c241_i32_13 = arith.constant 241 : i32
    %63 = tpu.dynamic_rotate %42 by %c241_i32_13 dim 1 : vector<16x256xf32>, i32 -> vector<16x256xf32>
    %64 = vector.extract_strided_slice %1 {offsets = [6, 0], sizes = [1, 256], strides = [1, 1]} : vector<9x256xf32> to vector<1x256xf32>
    %65 = vector.broadcast %64 : vector<1x256xf32> to vector<16x256xf32>
    %66 = arith.mulf %63, %65 : vector<16x256xf32>
    %c240_i32_14 = arith.constant 240 : i32
    %67 = tpu.dynamic_rotate %42 by %c240_i32_14 dim 1 : vector<16x256xf32>, i32 -> vector<16x256xf32>
    %68 = vector.extract_strided_slice %1 {offsets = [7, 0], sizes = [1, 256], strides = [1, 1]} : vector<9x256xf32> to vector<1x256xf32>
    %69 = vector.broadcast %68 : vector<1x256xf32> to vector<16x256xf32>
    %70 = arith.mulf %67, %69 : vector<16x256xf32>
    %c239_i32_15 = arith.constant 239 : i32
    %71 = tpu.dynamic_rotate %42 by %c239_i32_15 dim 1 : vector<16x256xf32>, i32 -> vector<16x256xf32>
    %72 = vector.extract_strided_slice %1 {offsets = [8, 0], sizes = [1, 256], strides = [1, 1]} : vector<9x256xf32> to vector<1x256xf32>
    %73 = vector.broadcast %72 : vector<1x256xf32> to vector<16x256xf32>
    %74 = arith.mulf %71, %73 : vector<16x256xf32>
    %75 = tpu.concatenate %46, %50, %54, %58, %42, %62, %66, %70, %74, %2 in 0 : vector<16x256xf32>, vector<16x256xf32>, vector<16x256xf32>, vector<16x256xf32>, vector<16x256xf32>, vector<16x256xf32>, vector<16x256xf32>, vector<16x256xf32>, vector<16x256xf32>, vector<1x256xf32> -> vector<145x256xf32>
    %c0_16 = arith.constant 0 : index
    %c0_17 = arith.constant 0 : index
    %76 = vector.load %arg4[%c0_16, %c0_17] : memref<8x145xf32, #tpu.memory_space<vmem>>, vector<8x145xf32>
    %cst_18 = arith.constant dense<0.000000e+00> : vector<8x256xf32>
    %77 = tpu.matmul %76, %75, %cst_18 {dimension_numbers = #tpu.dot_dimension_numbers<[1], [0], [0], [1], [0, 0, 1, 1], [], []>} : vector<8x145xf32>, vector<145x256xf32>, vector<8x256xf32> -> vector<8x256xf32>
    %cst_19 = arith.constant 0.000000e+00 : f32
    %78 = vector.broadcast %cst_19 : f32 to vector<8x256xf32>
    %79 = arith.cmpf ogt, %77, %78 : vector<8x256xf32>
    %cst_20 = arith.constant 1.000000e-01 : f32
    %80 = vector.broadcast %cst_20 : f32 to vector<8x256xf32>
    %81 = arith.mulf %80, %77 : vector<8x256xf32>
    %82 = arith.select %79, %77, %81 : vector<8x256xi1>, vector<8x256xf32>
    %c17_i32_21 = arith.constant 17 : i32
    %83 = tpu.dynamic_rotate %82 by %c17_i32_21 dim 1 : vector<8x256xf32>, i32 -> vector<8x256xf32>
    %84 = vector.extract_strided_slice %1 {offsets = [0, 0], sizes = [1, 256], strides = [1, 1]} : vector<9x256xf32> to vector<1x256xf32>
    %85 = vector.broadcast %84 : vector<1x256xf32> to vector<8x256xf32>
    %86 = arith.mulf %83, %85 : vector<8x256xf32>
    %c16_i32_22 = arith.constant 16 : i32
    %87 = tpu.dynamic_rotate %82 by %c16_i32_22 dim 1 : vector<8x256xf32>, i32 -> vector<8x256xf32>
    %88 = vector.extract_strided_slice %1 {offsets = [1, 0], sizes = [1, 256], strides = [1, 1]} : vector<9x256xf32> to vector<1x256xf32>
    %89 = vector.broadcast %88 : vector<1x256xf32> to vector<8x256xf32>
    %90 = arith.mulf %87, %89 : vector<8x256xf32>
    %c15_i32_23 = arith.constant 15 : i32
    %91 = tpu.dynamic_rotate %82 by %c15_i32_23 dim 1 : vector<8x256xf32>, i32 -> vector<8x256xf32>
    %92 = vector.extract_strided_slice %1 {offsets = [2, 0], sizes = [1, 256], strides = [1, 1]} : vector<9x256xf32> to vector<1x256xf32>
    %93 = vector.broadcast %92 : vector<1x256xf32> to vector<8x256xf32>
    %94 = arith.mulf %91, %93 : vector<8x256xf32>
    %c1_i32_24 = arith.constant 1 : i32
    %95 = tpu.dynamic_rotate %82 by %c1_i32_24 dim 1 : vector<8x256xf32>, i32 -> vector<8x256xf32>
    %96 = vector.extract_strided_slice %1 {offsets = [3, 0], sizes = [1, 256], strides = [1, 1]} : vector<9x256xf32> to vector<1x256xf32>
    %97 = vector.broadcast %96 : vector<1x256xf32> to vector<8x256xf32>
    %98 = arith.mulf %95, %97 : vector<8x256xf32>
    %c255_i32_25 = arith.constant 255 : i32
    %99 = tpu.dynamic_rotate %82 by %c255_i32_25 dim 1 : vector<8x256xf32>, i32 -> vector<8x256xf32>
    %100 = vector.extract_strided_slice %1 {offsets = [5, 0], sizes = [1, 256], strides = [1, 1]} : vector<9x256xf32> to vector<1x256xf32>
    %101 = vector.broadcast %100 : vector<1x256xf32> to vector<8x256xf32>
    %102 = arith.mulf %99, %101 : vector<8x256xf32>
    %c241_i32_26 = arith.constant 241 : i32
    %103 = tpu.dynamic_rotate %82 by %c241_i32_26 dim 1 : vector<8x256xf32>, i32 -> vector<8x256xf32>
    %104 = vector.extract_strided_slice %1 {offsets = [6, 0], sizes = [1, 256], strides = [1, 1]} : vector<9x256xf32> to vector<1x256xf32>
    %105 = vector.broadcast %104 : vector<1x256xf32> to vector<8x256xf32>
    %106 = arith.mulf %103, %105 : vector<8x256xf32>
    %c240_i32_27 = arith.constant 240 : i32
    %107 = tpu.dynamic_rotate %82 by %c240_i32_27 dim 1 : vector<8x256xf32>, i32 -> vector<8x256xf32>
    %108 = vector.extract_strided_slice %1 {offsets = [7, 0], sizes = [1, 256], strides = [1, 1]} : vector<9x256xf32> to vector<1x256xf32>
    %109 = vector.broadcast %108 : vector<1x256xf32> to vector<8x256xf32>
    %110 = arith.mulf %107, %109 : vector<8x256xf32>
    %c239_i32_28 = arith.constant 239 : i32
    %111 = tpu.dynamic_rotate %82 by %c239_i32_28 dim 1 : vector<8x256xf32>, i32 -> vector<8x256xf32>
    %112 = vector.extract_strided_slice %1 {offsets = [8, 0], sizes = [1, 256], strides = [1, 1]} : vector<9x256xf32> to vector<1x256xf32>
    %113 = vector.broadcast %112 : vector<1x256xf32> to vector<8x256xf32>
    %114 = arith.mulf %111, %113 : vector<8x256xf32>
    %115 = tpu.concatenate %86, %90, %94, %98, %82, %102, %106, %110, %114, %2 in 0 : vector<8x256xf32>, vector<8x256xf32>, vector<8x256xf32>, vector<8x256xf32>, vector<8x256xf32>, vector<8x256xf32>, vector<8x256xf32>, vector<8x256xf32>, vector<8x256xf32>, vector<1x256xf32> -> vector<73x256xf32>
    %c0_29 = arith.constant 0 : index
    %c0_30 = arith.constant 0 : index
    %116 = vector.load %arg5[%c0_29, %c0_30] : memref<8x73xf32, #tpu.memory_space<vmem>>, vector<8x73xf32>
    %cst_31 = arith.constant dense<0.000000e+00> : vector<8x256xf32>
    %117 = tpu.matmul %116, %115, %cst_31 {dimension_numbers = #tpu.dot_dimension_numbers<[1], [0], [0], [1], [0, 0, 1, 1], [], []>} : vector<8x73xf32>, vector<73x256xf32>, vector<8x256xf32> -> vector<8x256xf32>
    %cst_32 = arith.constant 0.000000e+00 : f32
    %118 = vector.broadcast %cst_32 : f32 to vector<8x256xf32>
    %119 = arith.cmpf ogt, %117, %118 : vector<8x256xf32>
    %cst_33 = arith.constant 1.000000e-01 : f32
    %120 = vector.broadcast %cst_33 : f32 to vector<8x256xf32>
    %121 = arith.mulf %120, %117 : vector<8x256xf32>
    %122 = arith.select %119, %117, %121 : vector<8x256xi1>, vector<8x256xf32>
    %c0_34 = arith.constant 0 : index
    %c0_35 = arith.constant 0 : index
    %123 = vector.load %arg6[%c0_34, %c0_35] : memref<8x256xf32, #tpu.memory_space<vmem>>, vector<8x256xf32>
    tpu.vector_store %arg6[%c0_34, %c0_35], %122 {strides = array<i32>} : memref<8x256xf32, #tpu.memory_space<vmem>>, vector<8x256xf32>,
    return
  }
  func.func @transform_0(%arg0: i32) -> (i32, i32) {
    %c0_i32 = arith.constant 0 : i32
    %c0_i32_0 = arith.constant 0 : i32
    %c0_i32_1 = arith.constant 0 : i32
    return %c0_i32, %c0_i32_0 : i32, i32
  }
  func.func @transform_1(%arg0: i32) -> (i32, i32) {
    %c0_i32 = arith.constant 0 : i32
    %c0_i32_0 = arith.constant 0 : i32
    %c0_i32_1 = arith.constant 0 : i32
    return %c0_i32, %c0_i32_0 : i32, i32
  }
  func.func @transform_2(%arg0: i32) -> (i32, i32) {
    %c0_i32 = arith.constant 0 : i32
    %c0_i32_0 = arith.constant 0 : i32
    %c0_i32_1 = arith.constant 0 : i32
    return %c0_i32, %c0_i32_0 : i32, i32
  }
  func.func @transform_3(%arg0: i32) -> (i32, i32) {
    %c0_i32 = arith.constant 0 : i32
    %c0_i32_0 = arith.constant 0 : i32
    %c0_i32_1 = arith.constant 0 : i32
    return %c0_i32, %c0_i32_0 : i32, i32
  }
  func.func @transform_4(%arg0: i32) -> (i32, i32) {
    %c0_i32 = arith.constant 0 : i32
    %c0_i32_0 = arith.constant 0 : i32
    %c0_i32_1 = arith.constant 0 : i32
    return %c0_i32, %c0_i32_0 : i32, i32
  }
  func.func @transform_5(%arg0: i32) -> (i32, i32) {
    %c0_i32 = arith.constant 0 : i32
    %c0_i32_0 = arith.constant 0 : i32
    %c0_i32_1 = arith.constant 0 : i32
    return %c0_i32, %c0_i32_0 : i32, i32
  }
}

</mosaic_0001>

<bundles_post_ra>
// kernel: tpu_custom_call.1
= control target key start
LH: loop header
LB: loop body
LE: loop exit
PB: predicated region body
PF: predicated region fallthrough
CT: control target
= control target key end

     0   :  { %10 = vsyncpa [#allocation3], 0  ;;  %s1521_s0 = inlined_call_operand.hbm [shape: f32[4,256], index: 0, kind: input, shape index: {}]   ;;  %s1522_s1 = inlined_call_operand.hbm [shape: f32[9,256], index: 1, kind: input, shape index: {}]   ;;  %s1523_s2 = inlined_call_operand.hbm [shape: f32[16,37], index: 2, kind: input, shape index: {}]   ;;  %s1524_s3 = inlined_call_operand.hbm [shape: f32[8,145], index: 3, kind: input, shape index: {}]   ;;  %s1525_s4 = inlined_call_operand.vmem [shape: f32[8,73], index: 4, kind: input, shape index: {}]   ;;  %s1526_s5 = inlined_call_operand.hbm [shape: f32[8,256], index: 5, kind: output, shape index: {}]  }
   0x1   :  { %11 = vsyncpa [#allocation6], 0 }
   0x2   :  { %12 = vsyncpa [#allocation9], 0 }
   0x3   :  { %13 = vsyncpa [#allocation4], 0  ;;  %s954_s18 = smov [#allocation5]   ;;  %s836_s22 = scalar_lea.hbm %s1522_s1, 512 }
   0x4   :  { %s29_s19 = sshll.u32 %s954_s18, 4  ;;  %p837_p0 = scmp.ne.s32.totalorder %s1522_s1, %s836_s22  ;;  %s30_s19 = int_to_ptr.vmem [resolvable:$true] %s29_s19 }
   0x5   :  { %p840_p1 = scmp.lt.u32.totalorder %s836_s22, %s1522_s1 }
   0x7   :  { %p842_p2 = pnand %p840_p1, %p837_p0 }
   0x9   :  { %845 = shalt.err (!%p842_p2)
}
   0xa   :  { %s846_s27 = scalar_lea.vmem %s30_s19, 512  ;;  %p851_p4 = scmp.lt.s32.totalorder %s30_s19, %s30_s19 }
   0xb   :  { %p847_p3 = scmp.ne.s32.totalorder %s30_s19, %s846_s27  ;;  %p852_p5 = scmp.lt.s32.totalorder %s846_s27, %s846_s27 }
   0xd   :  { %p853_p6 = por %p852_p5, %p851_p4 }
   0xf   :  { %p854_p7 = pnand %p853_p6, %p847_p3 }
  0x11   :  { %857 = shalt.err (!%p854_p7)
}
  0x12   :  { %s955_s28 = smov 256   ;;  %s956_s29 = smov 16  }
  0x13   :  { %35 = dma.hbm_to_vmem [thread:$0]  %s1522_s1, 512, %s30_s19, [#allocation6], %s955_s28, %s955_s28, %s956_s29  }
  0x14   :  { %s957_s7 = smov [#allocation2]   ;;  %s958_s9 = smov [#allocation7]  }
  0x15   :  { %s20_s8 = sshll.u32 %s957_s7, 4  ;;  %s41_s10 = sshll.u32 %s958_s9, 4  ;;  %s21_s8 = int_to_ptr.vmem [resolvable:$true] %s20_s8  ;;  %s42_s10 = int_to_ptr.vmem [resolvable:$true] %s41_s10 }
  0x16   :  { %s858_s13 = scalar_lea.hbm %s1521_s0, 128 }
  0x17   :  { %p859_p8 = scmp.ne.s32.totalorder %s1521_s0, %s858_s13  ;;  %p862_p9 = scmp.lt.u32.totalorder %s858_s13, %s1521_s0 }
  0x19   :  { %p864_p10 = pnand %p862_p9, %p859_p8 }
  0x1b   :  { %867 = shalt.err (!%p864_p10)
}
  0x1c   :  { %s868_s1 = scalar_lea.vmem %s21_s8, 128  ;;  %p873_p12 = scmp.lt.s32.totalorder %s21_s8, %s21_s8 }
  0x1d   :  { %p869_p11 = scmp.ne.s32.totalorder %s21_s8, %s868_s1  ;;  %p874_p13 = scmp.lt.s32.totalorder %s868_s1, %s868_s1 }
  0x1f   :  { %p875_p0 = por %p874_p13, %p873_p12 }
  0x21   :  { %p876_p1 = pnand %p875_p0, %p869_p11 }
  0x23   :  { %879 = shalt.err (!%p876_p1)
}
  0x24   :  { %23 = dma.hbm_to_vmem [thread:$0]  %s1521_s0, 128, %s21_s8, [#allocation3]  }
  0x25   :  { %s880_s22 = scalar_lea.hbm %s1523_s2, 256 }
  0x26   :  { %p881_p2 = scmp.ne.s32.totalorder %s1523_s2, %s880_s22  ;;  %p884_p3 = scmp.lt.u32.totalorder %s880_s22, %s1523_s2 }
  0x28   :  { %p886_p4 = pnand %p884_p3, %p881_p2 }
  0x2a   :  { %889 = shalt.err (!%p886_p4)
}
  0x2b   :  { %s890_s27 = scalar_lea.vmem %s42_s10, 256  ;;  %p895_p6 = scmp.lt.s32.totalorder %s42_s10, %s42_s10 }
  0x2c   :  { %p891_p5 = scmp.ne.s32.totalorder %s42_s10, %s890_s27  ;;  %p896_p7 = scmp.lt.s32.totalorder %s890_s27, %s890_s27 }
  0x2e   :  { %p897_p8 = por %p896_p7, %p895_p6 }
  0x30   :  { %p898_p9 = pnand %p897_p8, %p891_p5 }
  0x32   :  { %901 = shalt.err (!%p898_p9)
}
  0x33   :  { %s959_s0 = smov 128   ;;  %s960_s28 = smov 8  }
  0x34   :  { %47 = dma.hbm_to_vmem [thread:$0]  %s1523_s2, 256, %s42_s10, [#allocation6], %s959_s0, %s959_s0, %s960_s28  }
  0x35   :  { %s961_s7 = smov [#allocation8]   ;;  %s902_s12 = scalar_lea.hbm %s1524_s3, 256 }
  0x36   :  { %s54_s8 = sshll.u32 %s961_s7, 4  ;;  %p903_p10 = scmp.ne.s32.totalorder %s1524_s3, %s902_s12  ;;  %s55_s8 = int_to_ptr.vmem [resolvable:$true] %s54_s8 }
  0x37   :  { %p906_p11 = scmp.lt.u32.totalorder %s902_s12, %s1524_s3 }
  0x39   :  { %p908_p12 = pnand %p906_p11, %p903_p10 }
  0x3b   :  { %911 = shalt.err (!%p908_p12)
}
  0x3c   :  { %s912_s17 = scalar_lea.vmem %s55_s8, 256  ;;  %p917_p0 = scmp.lt.s32.totalorder %s55_s8, %s55_s8 }
  0x3d   :  { %p913_p13 = scmp.ne.s32.totalorder %s55_s8, %s912_s17  ;;  %p918_p1 = scmp.lt.s32.totalorder %s912_s17, %s912_s17 }
  0x3f   :  { %p919_p2 = por %p918_p1, %p917_p0 }
  0x41   :  { %p920_p3 = pnand %p919_p2, %p913_p13 }
  0x43   :  { %923 = shalt.err (!%p920_p3)
}
  0x44   :  { %57 = dma.hbm_to_vmem [thread:$0]  %s1524_s3, 256, %s55_s8, [#allocation9]  }
  0x45   :  { %946 = dma.done.wait [#allocation3], 128  }
  0x46   :  { %947 = vsyncadd [#allocation3], 4294967168 }
  0x47   :  { %948 = dma.done.wait [#allocation6], 768  }
  0x48   :  { %949 = vsyncadd [#allocation6], 4294966528 }
  0x49   :  { %950 = dma.done.wait [#allocation9], 256  }
  0x4a   :  { %951 = vsyncadd [#allocation9], 4294967040  ;;  %v1052_v0 = vld [vmem:[#allocation2] sm:$0xff]  ;;  %s962_s1 = smov 1   ;;  %s963_s3 = smov 17   ;;  %v967_v2 = vmov 0.0   ;;  %v84_v3 = vlaneseq }
  0x4b   :  { %133 = vrot.lane.b32.xlu1 %v1052_v0, %s962_s1  ;;  %99 = vrot.lane.b32.xlu0 %v1052_v0, %s956_s29  ;;  %v1060_v1 = vcombine.high %v1052_v0, %v1052_v0  ;;  %s964_s18 = smov 15   ;;  %s965_s19 = smov 127   ;;  %v1096_v9 = vld [vmem:[#allocation5] sm:$0xff]  ;;  %v1098_v10 = vld [vmem:[#allocation5 + $0x8] sm:$0xff]  ;;  %vm242_vm4 = vcmask 1043456   ;;  %vm262_vm9 = vcmask 1044480  }
  0x4c   :  { %s966_s20 = smov 112   ;;  %333 = vmatprep.mubr.f32.mxu0 %v967_v2  ;;  %s968_s21 = smov 113   ;;  %v1091_v4 = vshrl.u32 %v84_v3, 7  ;;  %v1093_v5 = vand.u32 127, %v84_v3  ;;  %vm255_vm10 = vcmask 302080   ;;  %vm488_vm15 = vcmask 138240  }
  0x4d   :  { %s969_s22 = smov 111   ;;  %s972_s24 = smov [#allocation10]  }
  0x4e   :  { %v142_v8 = vsub.s32 3, %v1091_v4  ;;  %v108_v11 = vsub.s32 1, %v1091_v4  ;;  %vm137_vm0 = vcmp.lt.s32.totalorder %v1093_v5, 1  ;;  %v91_v14 = vsub.s32 0, %v1091_v4  ;;  %s727_s25 = sshll.u32 %s972_s24, 4  ;;  %s728_s25 = int_to_ptr.vmem [resolvable:$true] %s727_s25 }
  0x4f   :  { %80 = vrot.lane.b32.xlu0 %v1052_v0, %s963_s3  ;;  %135 = vrot.lane.b32.xlu1 %v1060_v1, %s962_s1  ;;  %vm103_vm1 = vcmp.lt.s32.totalorder %v1093_v5, 16  ;;  %v125_v17 = vsub.s32 2, %v1091_v4  ;;  %vm86_vm2 = vcmp.lt.s32.totalorder %v1093_v5, 17  ;;  %vm120_vm3 = vcmp.lt.s32.totalorder %v1093_v5, 15  ;;  %s924_s26 = scalar_lea.vmem %s728_s25, 256  ;;  %p929_p5 = scmp.lt.s32.totalorder %s728_s25, %s728_s25 }
  0x50   :  { %v1104_v15 = vrot.slane %v1096_v9, %v142_v8  ;;  %v1107_v16 = vrot.slane %v1098_v10, %v142_v8  ;;  %v1116_v20 = vrot.slane %v1096_v9, %v108_v11  ;;  %v1119_v21 = vrot.slane %v1098_v10, %v108_v11  ;;  %p925_p4 = scmp.ne.s32.totalorder %s728_s25, %s924_s26  ;;  %p930_p6 = scmp.lt.s32.totalorder %s924_s26, %s924_s26 }
  0x51   :  { %v1123_v22 = vrot.slane %v1096_v9, %v91_v14  ;;  %v1126_v23 = vrot.slane %v1098_v10, %v91_v14  ;;  %v1138_v32 = vrot.slane %v1096_v9, %v125_v17  ;;  %v1141_v33 = vrot.slane %v1098_v10, %v125_v17 }
  0x52   :  { %v159_v36 = vsub.s32 5, %v1091_v4  ;;  %vm154_vm5 = vcmp.lt.s32.totalorder %v1093_v5, 127  ;;  %v193_v41 = vsub.s32 7, %v1091_v4  ;;  %vm188_vm6 = vcmp.lt.s32.totalorder %v1093_v5, 112  ;;  %p931_p7 = por %p930_p6, %p929_p5 }
  0x53   :  { %82 = vrot.lane.b32.xlu1 %v1060_v1, %s963_s3  ;;  %101 = vrot.lane.b32.xlu0 %v1060_v1, %s956_s29  ;;  %v176_v3 = vsub.s32 6, %v1091_v4  ;;  %vm171_vm7 = vcmp.lt.s32.totalorder %v1093_v5, 113  ;;  %vm205_vm8 = vcmp.lt.s32.totalorder %v1093_v5, 111  ;;  %v637_v5 = vld [vmem:[%s1525_s4] sm:$0xff] }
  0x54   :  { %v1159_v50 = vrot.slane %v1096_v9, %v159_v36  ;;  %v1162_v51 = vrot.slane %v1098_v10, %v159_v36  ;;  %v1174_v62 = vrot.slane %v1096_v9, %v193_v41  ;;  %v1177_v63 = vrot.slane %v1098_v10, %v193_v41  ;;  %p932_p8 = pnand %p931_p7, %p925_p4 }
  0x55   :  { %v1190_v17 = vrot.slane %v1096_v9, %v176_v3 }
  0x57   :  { %118 = vrot.lane.b32.xlu1 %v1060_v1, %s964_s18  ;;  %116 = vrot.lane.b32.xlu0 %v1052_v0, %s964_s18 }
  0x5b   :  { %152 = vrot.lane.b32.xlu1 %v1060_v1, %s965_s19  ;;  %150 = vrot.lane.b32.xlu0 %v1052_v0, %s965_s19 }
  0x5f   :  { %186 = vrot.lane.b32.xlu1 %v1060_v1, %s966_s20  ;;  %184 = vrot.lane.b32.xlu0 %v1052_v0, %s966_s20 }
  0x63   :  { %169 = vrot.lane.b32.xlu1 %v1060_v1, %s968_s21  ;;  %167 = vrot.lane.b32.xlu0 %v1052_v0, %s968_s21 }
  0x67   :  { %203 = vrot.lane.b32.xlu1 %v1060_v1, %s969_s22  ;;  %201 = vrot.lane.b32.xlu0 %v1052_v0, %s969_s22 }
  0xbd   :  { %v134_v6 = vpop.permute.xlu1 %133  ;;  %v100_v7 = vpop.permute.xlu0 %99 }
  0xc1   :  { %v81_v12 = vpop.permute.xlu0 %80  ;;  %v136_v13 = vpop.permute.xlu1 %135 }
  0xc2   :  { %v138_v18 = vsel %vm137_vm0, %v134_v6, %v136_v13  ;;  %v139_v19 = vsel %vm137_vm0, %v136_v13, %v134_v6 }
  0xc3   :  { %v148_v26 = vmul.f32 %v1104_v15, %v139_v19  ;;  %v149_v27 = vmul.f32 %v1107_v16, %v138_v18  ;;  %v1193_v18 = vrot.slane %v1098_v10, %v176_v3  ;;  %v1202_v10 = vld [vmem:[#allocation5 + $0x10] ss:$0 sm:$0xff] }
  0xc5   :  { %v83_v24 = vpop.permute.xlu1 %82  ;;  %v102_v25 = vpop.permute.xlu0 %101  ;;  %v226_v42 = vrot.slane %v148_v26, 4  ;;  %v227_v43 = vrot.slane %v149_v27, 4 }
  0xc6   :  { %v104_v28 = vsel %vm103_vm1, %v100_v7, %v102_v25  ;;  %v105_v29 = vsel %vm103_vm1, %v102_v25, %v100_v7  ;;  %v87_v34 = vsel %vm86_vm2, %v81_v12, %v83_v24  ;;  %v88_v35 = vsel %vm86_vm2, %v83_v24, %v81_v12 }
  0xc7   :  { %v114_v30 = vmul.f32 %v1116_v20, %v105_v29  ;;  %v115_v31 = vmul.f32 %v1119_v21, %v104_v28  ;;  %v97_v46 = vmul.f32 %v1123_v22, %v88_v35  ;;  %v98_v47 = vmul.f32 %v1126_v23, %v87_v34  ;;  %v1204_v34 = vld [vmem:[#allocation5 + $0x18] ss:$0 sm:$0xff] }
  0xc9   :  { %v220_v37 = vrot.slane %v114_v30, 4  ;;  %v221_v38 = vrot.slane %v115_v31, 4  ;;  %v119_v39 = vpop.permute.xlu1 %118  ;;  %v117_v40 = vpop.permute.xlu0 %116 }
  0xca   :  { %v121_v44 = vsel %vm120_vm3, %v117_v40, %v119_v39  ;;  %v122_v45 = vsel %vm120_vm3, %v119_v39, %v117_v40 }
  0xcb   :  { %v131_v48 = vmul.f32 %v1138_v32, %v122_v45  ;;  %v132_v49 = vmul.f32 %v1141_v33, %v121_v44  ;;  %v244_v54 = vsel %vm242_vm4, %v98_v47, %v221_v38  ;;  %v243_v56 = vsel %vm242_vm4, %v97_v46, %v220_v37  ;;  %v253_v47 = vld [vmem:[#allocation7] sm:$0xff] }
  0xcd   :  { %v153_v52 = vpop.permute.xlu1 %152  ;;  %v151_v53 = vpop.permute.xlu0 %150  ;;  %v246_v55 = vsel %vm242_vm4, %v132_v49, %v227_v43  ;;  %v245_v57 = vsel %vm242_vm4, %v131_v48, %v226_v42  ;;  %v254_v48 = vld [vmem:[#allocation7 + $0x8] sm:$0xff] }
  0xce   :  { %v155_v58 = vsel %vm154_vm5, %v151_v53, %v153_v52  ;;  %v156_v59 = vsel %vm154_vm5, %v153_v52, %v151_v53  ;;  %v750_v60 = vpack.c.bf16 %v246_v55, %v244_v54  ;;  %v752_v61 = vpack.c.bf16 %v245_v57, %v243_v56 }
  0xcf   :  { %v165_v6 = vmul.f32 %v1159_v50, %v155_v58  ;;  %v166_v7 = vmul.f32 %v1162_v51, %v156_v59 }
  0xd0   :  { %751 = vmatprep.subr.bf16.mxu0 %v750_v60 }
  0xd1   :  { %v187_v8 = vpop.permute.xlu1 %186  ;;  %753 = vmatpush1.bf16.msra.mxu0 %v752_v61  ;;  %v185_v11 = vpop.permute.xlu0 %184  ;;  %v232_v19 = vrot.slane %v165_v6, 4  ;;  %v233_v24 = vrot.slane %v166_v7, 4  ;;  %v487_v7 = vld [vmem:[#allocation8 + $0x8] sm:$0xff] }
  0xd2   :  { %v189_v12 = vsel %vm188_vm6, %v185_v11, %v187_v8  ;;  %v190_v13 = vsel %vm188_vm6, %v187_v8, %v185_v11  ;;  %746 = vmatprep.mubr.msk.f32.mxu1 %vm488_vm15, %v487_v7 }
  0xd3   :  { %v199_v14 = vmul.f32 %v1174_v62, %v189_v12  ;;  %v200_v4 = vmul.f32 %v1177_v63, %v190_v13  ;;  %v248_v37 = vsel %vm242_vm4, %v1060_v1, %v233_v24  ;;  %v247_v39 = vsel %vm242_vm4, %v1052_v0, %v232_v19 }
  0xd5   :  { %v170_v25 = vpop.permute.xlu1 %169  ;;  %v168_v26 = vpop.permute.xlu0 %167  ;;  %v238_v29 = vrot.slane %v199_v14, 4  ;;  %v239_v30 = vrot.slane %v200_v4, 4 }
  0xd6   :  { %v172_v27 = vsel %vm171_vm7, %v168_v26, %v170_v25  ;;  %v173_v28 = vsel %vm171_vm7, %v170_v25, %v168_v26 }
  0xd7   :  { %v182_v9 = vmul.f32 %v1190_v17, %v172_v27  ;;  %v183_v31 = vmul.f32 %v1193_v18, %v173_v28 }
  0xd9   :  { %v204_v35 = vpop.permute.xlu1 %203  ;;  %v202_v36 = vpop.permute.xlu0 %201  ;;  %v250_v38 = vsel %vm242_vm4, %v183_v31, %v239_v30  ;;  %v249_v40 = vsel %vm242_vm4, %v182_v9, %v238_v29 }
  0xda   :  { %v206_v41 = vsel %vm205_vm8, %v202_v36, %v204_v35  ;;  %v207_v42 = vsel %vm205_vm8, %v204_v35, %v202_v36  ;;  %v754_v43 = vpack.c.bf16 %v250_v38, %v248_v37  ;;  %v756_v44 = vpack.c.bf16 %v249_v40, %v247_v39 }
  0xdb   :  { %v216_v45 = vmul.f32 %v1202_v10, %v206_v41  ;;  %v217_v46 = vmul.f32 %v1204_v34, %v207_v42 }
  0xdc   :  { %755 = vmatprep.subr.bf16.mxu0 %v754_v43 }
  0xdd   :  { %757 = vmatpush1.bf16.msra.mxu0 %v756_v44  ;;  %v252_v1 = vsel %vm242_vm4, %v217_v46, 1.0  ;;  %v251_v0 = vsel %vm242_vm4, %v216_v45, 1.0  ;;  %vm492_vm4 = vcmask 1040384  }
  0xde   :  { %740 = vmatprep.subr.msk.mxu0 %vm262_vm9, %v252_v1 }
  0xe1   :  { %741 = vmatpush1.msk.msra.mxu0 %vm262_vm9, %v251_v0 }
  0xe2   :  { %742 = vmatmul.mubr.msk.f32.vlgmr.msra.gmra.mrb[0].mxu0 %vm255_vm10, %v253_v47 }
  0xe3   :  { %339 = vmatprep.mubr.f32.mxu0 %v967_v2 }
  0xe6   :  { %743 = vmatmul.mubr.msk.f32.gmra.mrb[2].mxu0 %vm255_vm10, %v254_v48 }
  0xe7   :  { %706 = vmatprep.mubr.f32.mxu0 %v967_v2 }
 0x1b5   :  { %v335_v49 = vpop.f32.mrb[0].mxu0 }
 0x1b6   :  { %vm346_vm11 = vcmp.gt.f32.partialorder %v335_v49, 0.0  ;;  %v350_v52 = vmul.f32 0.1, %v335_v49  ;;  %v337_v53 = vpop.f32.mrb[1].mxu0 }
 0x1b7   :  { %v351_v55 = vmul.f32 0.1, %v337_v53  ;;  %vm347_vm12 = vcmp.gt.f32.partialorder %v337_v53, 0.0 }
 0x1b8   :  { %v1222_v54 = vsel %vm346_vm11, %v335_v49, %v350_v52 }
 0x1b9   :  { %358 = vrot.lane.b32.xlu0 %v1222_v54, %s963_s3  ;;  %v341_v56 = vpop.f32.mrb[2].mxu0  ;;  %v1228_v2 = vsel %vm347_vm12, %v337_v53, %v351_v55 }
 0x1ba   :  { %vm348_vm13 = vcmp.gt.f32.partialorder %v341_v56, 0.0  ;;  %v352_v57 = vmul.f32 0.1, %v341_v56  ;;  %v343_v58 = vpop.f32.mrb[3].mxu0 }
 0x1bb   :  { %vm349_vm14 = vcmp.gt.f32.partialorder %v343_v58, 0.0  ;;  %v353_v59 = vmul.f32 0.1, %v343_v58 }
 0x1bc   :  { %v1226_v60 = vsel %vm348_vm13, %v341_v56, %v352_v57 }
 0x1bd   :  { %v1230_v61 = vsel %vm349_vm14, %v343_v58, %v353_v59  ;;  %374 = vrot.lane.b32.xlu0 %v1222_v54, %s956_s29  ;;  %360 = vrot.lane.b32.xlu1 %v1226_v60, %s963_s3  ;;  %v776_v3 = vpack.c.bf16 %v1226_v60, %v1222_v54 }
 0x1be   :  { %v774_v6 = vpack.c.bf16 %v1230_v61, %v1228_v2 }
 0x1c1   :  { %390 = vrot.lane.b32.xlu0 %v1222_v54, %s964_s18  ;;  %376 = vrot.lane.b32.xlu1 %v1226_v60, %s956_s29 }
 0x1c5   :  { %406 = vrot.lane.b32.xlu0 %v1222_v54, %s962_s1  ;;  %392 = vrot.lane.b32.xlu1 %v1226_v60, %s964_s18 }
 0x1c9   :  { %422 = vrot.lane.b32.xlu0 %v1222_v54, %s965_s19  ;;  %408 = vrot.lane.b32.xlu1 %v1226_v60, %s962_s1 }
 0x1cd   :  { %438 = vrot.lane.b32.xlu0 %v1222_v54, %s968_s21  ;;  %424 = vrot.lane.b32.xlu1 %v1226_v60, %s965_s19 }
 0x1d1   :  { %454 = vrot.lane.b32.xlu0 %v1222_v54, %s966_s20  ;;  %440 = vrot.lane.b32.xlu1 %v1226_v60, %s968_s21 }
 0x1d5   :  { %362 = vrot.lane.b32.xlu0 %v1228_v2, %s963_s3  ;;  %456 = vrot.lane.b32.xlu1 %v1226_v60, %s966_s20 }
 0x1d9   :  { %378 = vrot.lane.b32.xlu0 %v1228_v2, %s956_s29  ;;  %364 = vrot.lane.b32.xlu1 %v1230_v61, %s963_s3 }
 0x1dd   :  { %394 = vrot.lane.b32.xlu0 %v1228_v2, %s964_s18  ;;  %380 = vrot.lane.b32.xlu1 %v1230_v61, %s956_s29 }
 0x1e1   :  { %410 = vrot.lane.b32.xlu0 %v1228_v2, %s962_s1  ;;  %396 = vrot.lane.b32.xlu1 %v1230_v61, %s964_s18 }
 0x1e5   :  { %470 = vrot.lane.b32.xlu0 %v1222_v54, %s969_s22  ;;  %412 = vrot.lane.b32.xlu1 %v1230_v61, %s962_s1 }
 0x1e9   :  { %426 = vrot.lane.b32.xlu0 %v1228_v2, %s965_s19  ;;  %472 = vrot.lane.b32.xlu1 %v1226_v60, %s969_s22 }
 0x1ed   :  { %442 = vrot.lane.b32.xlu0 %v1228_v2, %s968_s21  ;;  %428 = vrot.lane.b32.xlu1 %v1230_v61, %s965_s19 }
 0x1f1   :  { %458 = vrot.lane.b32.xlu0 %v1228_v2, %s966_s20  ;;  %444 = vrot.lane.b32.xlu1 %v1230_v61, %s968_s21 }
 0x1f5   :  { %474 = vrot.lane.b32.xlu0 %v1228_v2, %s969_s22  ;;  %460 = vrot.lane.b32.xlu1 %v1230_v61, %s966_s20 }
 0x1f9   :  { %476 = vrot.lane.b32.xlu1 %v1230_v61, %s969_s22 }
 0x22b   :  { %v359_v8 = vpop.permute.xlu0 %358 }
 0x22f   :  { %v375_v11 = vpop.permute.xlu0 %374  ;;  %v361_v12 = vpop.permute.xlu1 %360 }
 0x233   :  { %v391_v13 = vpop.permute.xlu0 %390  ;;  %v377_v14 = vpop.permute.xlu1 %376 }
 0x237   :  { %v407_v4 = vpop.permute.xlu0 %406  ;;  %v393_v19 = vpop.permute.xlu1 %392 }
 0x23b   :  { %v1298_v24 = vpop.permute.xlu0 %422  ;;  %v409_v25 = vpop.permute.xlu1 %408 }
 0x23f   :  { %v1300_v26 = vpop.permute.xlu0 %438  ;;  %v1302_v27 = vpop.permute.xlu1 %424 }
 0x243   :  { %v1304_v28 = vpop.permute.xlu0 %454  ;;  %v1306_v29 = vpop.permute.xlu1 %440 }
 0x247   :  { %v363_v30 = vpop.permute.xlu0 %362  ;;  %v1308_v9 = vpop.permute.xlu1 %456 }
 0x248   :  { %v366_v31 = vsel %vm86_vm2, %v359_v8, %v363_v30  ;;  %v368_v35 = vsel %vm86_vm2, %v363_v30, %v359_v8 }
 0x249   :  { %v370_v40 = vmul.f32 %v368_v35, %v1123_v22  ;;  %v371_v42 = vmul.f32 %v366_v31, %v1126_v23 }
 0x24b   :  { %v379_v36 = vpop.permute.xlu0 %378  ;;  %v365_v37 = vpop.permute.xlu1 %364 }
 0x24c   :  { %v367_v38 = vsel %vm86_vm2, %v361_v12, %v365_v37  ;;  %v369_v39 = vsel %vm86_vm2, %v365_v37, %v361_v12  ;;  %v382_v44 = vsel %vm103_vm1, %v375_v11, %v379_v36  ;;  %v384_v45 = vsel %vm103_vm1, %v379_v36, %v375_v11 }
 0x24d   :  { %v372_v41 = vmul.f32 %v369_v39, %v1123_v22  ;;  %v373_v43 = vmul.f32 %v367_v38, %v1126_v23  ;;  %v386_v52 = vmul.f32 %v384_v45, %v1116_v20  ;;  %v387_v53 = vmul.f32 %v382_v44, %v1119_v21 }
 0x24f   :  { %v395_v46 = vpop.permute.xlu0 %394  ;;  %v381_v1 = vpop.permute.xlu1 %380  ;;  %v758_v0 = vpack.c.bf16 %v373_v43, %v371_v42  ;;  %v760_v47 = vpack.c.bf16 %v372_v41, %v370_v40 }
 0x250   :  { %v383_v48 = vsel %vm103_vm1, %v377_v14, %v381_v1  ;;  %v385_v49 = vsel %vm103_vm1, %v381_v1, %v377_v14  ;;  %v398_v57 = vsel %vm120_vm3, %v391_v13, %v395_v46  ;;  %v400_v58 = vsel %vm120_vm3, %v395_v46, %v391_v13 }
 0x251   :  { %v388_v55 = vmul.f32 %v385_v49, %v1116_v20  ;;  %v389_v56 = vmul.f32 %v383_v48, %v1119_v21  ;;  %759 = vmatprep.subr.bf16.mxu1 %v758_v0  ;;  %v402_v30 = vmul.f32 %v400_v58, %v1138_v32  ;;  %v403_v31 = vmul.f32 %v398_v57, %v1141_v33 }
 0x252   :  { %761 = vmatpush1.bf16.msra.mxu1 %v760_v47 }
 0x253   :  { %v411_v59 = vpop.permute.xlu0 %410  ;;  %v397_v7 = vpop.permute.xlu1 %396  ;;  %v762_v8 = vpack.c.bf16 %v389_v56, %v387_v53  ;;  %v764_v11 = vpack.c.bf16 %v388_v55, %v386_v52 }
 0x254   :  { %v399_v12 = vsel %vm120_vm3, %v393_v19, %v397_v7  ;;  %v401_v14 = vsel %vm120_vm3, %v397_v7, %v393_v19  ;;  %v414_v13 = vsel %vm137_vm0, %v407_v4, %v411_v59  ;;  %v416_v37 = vsel %vm137_vm0, %v411_v59, %v407_v4 }
 0x255   :  { %v404_v35 = vmul.f32 %v401_v14, %v1138_v32  ;;  %v405_v36 = vmul.f32 %v399_v12, %v1141_v33  ;;  %763 = vmatprep.subr.bf16.mxu1 %v762_v8  ;;  %v418_v43 = vmul.f32 %v416_v37, %v1104_v15  ;;  %v419_v44 = vmul.f32 %v414_v13, %v1107_v16 }
 0x256   :  { %765 = vmatpush1.bf16.msra.mxu1 %v764_v11 }
 0x257   :  { %v471_v38 = vpop.permute.xlu0 %470  ;;  %v413_v39 = vpop.permute.xlu1 %412  ;;  %v766_v40 = vpack.c.bf16 %v405_v36, %v403_v31  ;;  %v768_v19 = vpack.c.bf16 %v404_v35, %v402_v30 }
 0x258   :  { %v415_v41 = vsel %vm137_vm0, %v409_v25, %v413_v39  ;;  %v417_v42 = vsel %vm137_vm0, %v413_v39, %v409_v25 }
 0x259   :  { %v420_v45 = vmul.f32 %v417_v42, %v1104_v15  ;;  %v421_v46 = vmul.f32 %v415_v41, %v1107_v16  ;;  %767 = vmatprep.subr.bf16.mxu1 %v766_v40 }
 0x25a   :  { %769 = vmatpush1.bf16.msra.mxu1 %v768_v19 }
 0x25b   :  { %v427_v4 = vpop.permute.xlu0 %426  ;;  %v473_v1 = vpop.permute.xlu1 %472  ;;  %v770_v0 = vpack.c.bf16 %v421_v46, %v419_v44  ;;  %v772_v47 = vpack.c.bf16 %v420_v45, %v418_v43 }
 0x25c   :  { %v430_v48 = vsel %vm154_vm5, %v1298_v24, %v427_v4  ;;  %v432_v25 = vsel %vm154_vm5, %v427_v4, %v1298_v24 }
 0x25d   :  { %771 = vmatprep.subr.bf16.mxu1 %v770_v0  ;;  %v434_v56 = vmul.f32 %v430_v48, %v1159_v50  ;;  %v435_v57 = vmul.f32 %v432_v25, %v1162_v51  ;;  %v970_v25 = vmov 1.0  }
 0x25e   :  { %773 = vmatpush1.bf16.msra.mxu1 %v772_v47 }
 0x25f   :  { %v443_v49 = vpop.permute.xlu0 %442  ;;  %v429_v52 = vpop.permute.xlu1 %428  ;;  %775 = vmatprep.subr.bf16.mxu1 %v774_v6 }
 0x260   :  { %v431_v53 = vsel %vm154_vm5, %v1302_v27, %v429_v52  ;;  %v433_v55 = vsel %vm154_vm5, %v429_v52, %v1302_v27  ;;  %v446_v2 = vsel %vm171_vm7, %v1300_v26, %v443_v49  ;;  %v448_v61 = vsel %vm171_vm7, %v443_v49, %v1300_v26 }
 0x261   :  { %v436_v24 = vmul.f32 %v431_v53, %v1159_v50  ;;  %v437_v58 = vmul.f32 %v433_v55, %v1162_v51  ;;  %v450_v12 = vmul.f32 %v446_v2, %v1190_v17  ;;  %v451_v26 = vmul.f32 %v448_v61, %v1193_v18 }
 0x262   :  { %777 = vmatpush1.bf16.msra.mxu1 %v776_v3 }
 0x263   :  { %v459_v6 = vpop.permute.xlu0 %458  ;;  %v445_v27 = vpop.permute.xlu1 %444  ;;  %v778_v59 = vpack.c.bf16 %v437_v58, %v435_v57  ;;  %v780_v7 = vpack.c.bf16 %v436_v24, %v434_v56 }
 0x264   :  { %v447_v8 = vsel %vm171_vm7, %v1306_v29, %v445_v27  ;;  %v449_v11 = vsel %vm171_vm7, %v445_v27, %v1306_v29  ;;  %v462_v60 = vsel %vm188_vm6, %v1304_v28, %v459_v6  ;;  %v464_v3 = vsel %vm188_vm6, %v459_v6, %v1304_v28 }
 0x265   :  { %v452_v14 = vmul.f32 %v447_v8, %v1190_v17  ;;  %v453_v54 = vmul.f32 %v449_v11, %v1193_v18  ;;  %779 = vmatprep.subr.bf16.mxu1 %v778_v59  ;;  %v466_v37 = vmul.f32 %v462_v60, %v1174_v62  ;;  %v467_v39 = vmul.f32 %v464_v3, %v1177_v63 }
 0x266   :  { %781 = vmatpush1.bf16.msra.mxu1 %v780_v7 }
 0x267   :  { %v475_v30 = vpop.permute.xlu0 %474  ;;  %v461_v29 = vpop.permute.xlu1 %460  ;;  %v782_v31 = vpack.c.bf16 %v453_v54, %v451_v26  ;;  %v784_v35 = vpack.c.bf16 %v452_v14, %v450_v12 }
 0x268   :  { %v463_v36 = vsel %vm188_vm6, %v1308_v9, %v461_v29  ;;  %v465_v13 = vsel %vm188_vm6, %v461_v29, %v1308_v9  ;;  %v478_v19 = vsel %vm205_vm8, %v471_v38, %v475_v30  ;;  %v480_v41 = vsel %vm205_vm8, %v475_v30, %v471_v38 }
 0x269   :  { %v468_v40 = vmul.f32 %v463_v36, %v1174_v62  ;;  %v469_v28 = vmul.f32 %v465_v13, %v1177_v63  ;;  %783 = vmatprep.subr.bf16.mxu1 %v782_v31  ;;  %v482_v46 = vmul.f32 %v1202_v10, %v478_v19  ;;  %v483_v4 = vmul.f32 %v1204_v34, %v480_v41 }
 0x26a   :  { %785 = vmatpush1.bf16.msra.mxu1 %v784_v35 }
 0x26b   :  { %v477_v42 = vpop.permute.xlu1 %476  ;;  %v786_v43 = vpack.c.bf16 %v469_v28, %v467_v39  ;;  %v788_v44 = vpack.c.bf16 %v468_v40, %v466_v37 }
 0x26c   :  { %v479_v9 = vsel %vm205_vm8, %v473_v1, %v477_v42  ;;  %v481_v45 = vsel %vm205_vm8, %v477_v42, %v473_v1  ;;  %v486_v1 = vld [vmem:[#allocation8] sm:$0xff] }
 0x26d   :  { %v484_v0 = vmul.f32 %v1202_v10, %v479_v9  ;;  %v485_v47 = vmul.f32 %v1204_v34, %v481_v45  ;;  %787 = vmatprep.subr.bf16.mxu1 %v786_v43 }
 0x26e   :  { %789 = vmatpush1.bf16.msra.mxu1 %v788_v44 }
 0x26f   :  { %v790_v38 = vpack.c.bf16 %v485_v47, %v483_v4  ;;  %v792_v48 = vpack.c.bf16 %v484_v0, %v482_v46 }
 0x271   :  { %791 = vmatprep.subr.bf16.mxu1 %v790_v38 }
 0x272   :  { %793 = vmatpush1.bf16.msra.mxu1 %v792_v48 }
 0x273   :  { %744 = vmatprep.subr.msk.mxu1 %vm492_vm4, %v970_v25 }
 0x276   :  { %745 = vmatpush1.msk.msra.mxu1 %vm492_vm4, %v970_v25 }
 0x277   :  { %561 = vmatmul.mubr.f32.vlgmr.msra.gmra.mrb[0].mxu1 %v486_v1 }
 0x34a   :  { %v562_v49 = vpop.f32.mrb[0].mxu1 }
 0x34b   :  { %vm567_vm9 = vcmp.gt.f32.partialorder %v562_v49, 0.0  ;;  %v569_v52 = vmul.f32 0.1, %v562_v49  ;;  %v564_v53 = vpop.f32.mrb[1].mxu1 }
 0x34c   :  { %vm568_vm10 = vcmp.gt.f32.partialorder %v564_v53, 0.0  ;;  %v570_v55 = vmul.f32 0.1, %v564_v53 }
 0x34d   :  { %v1428_v56 = vsel %vm567_vm9, %v562_v49, %v569_v52 }
 0x34e   :  { %v572_v57 = vsel %vm568_vm10, %v564_v53, %v570_v55  ;;  %573 = vrot.lane.b32.xlu0 %v1428_v56, %s963_s3 }
 0x34f   :  { %575 = vrot.lane.b32.xlu1 %v572_v57, %s963_s3 }
 0x352   :  { %581 = vrot.lane.b32.xlu0 %v1428_v56, %s956_s29 }
 0x353   :  { %583 = vrot.lane.b32.xlu1 %v572_v57, %s956_s29 }
 0x356   :  { %589 = vrot.lane.b32.xlu0 %v1428_v56, %s964_s18 }
 0x357   :  { %591 = vrot.lane.b32.xlu1 %v572_v57, %s964_s18 }
 0x35a   :  { %597 = vrot.lane.b32.xlu0 %v1428_v56, %s962_s1 }
 0x35b   :  { %599 = vrot.lane.b32.xlu1 %v572_v57, %s962_s1 }
 0x35e   :  { %605 = vrot.lane.b32.xlu0 %v1428_v56, %s965_s19 }
 0x35f   :  { %607 = vrot.lane.b32.xlu1 %v572_v57, %s965_s19 }
 0x362   :  { %613 = vrot.lane.b32.xlu0 %v1428_v56, %s968_s21 }
 0x363   :  { %615 = vrot.lane.b32.xlu1 %v572_v57, %s968_s21 }
 0x366   :  { %621 = vrot.lane.b32.xlu0 %v1428_v56, %s966_s20 }
 0x367   :  { %623 = vrot.lane.b32.xlu1 %v572_v57, %s966_s20 }
 0x36a   :  { %629 = vrot.lane.b32.xlu0 %v1428_v56, %s969_s22 }
 0x36b   :  { %631 = vrot.lane.b32.xlu1 %v572_v57, %s969_s22 }
 0x3c0   :  { %v574_v24 = vpop.permute.xlu0 %573 }
 0x3c1   :  { %v576_v58 = vpop.permute.xlu1 %575 }
 0x3c2   :  { %v577_v2 = vsel %vm86_vm2, %v574_v24, %v576_v58  ;;  %v578_v61 = vsel %vm86_vm2, %v576_v58, %v574_v24  ;;  %vm638_vm2 = vcmask 596992  }
 0x3c3   :  { %v579_v8 = vmul.f32 %v578_v61, %v1123_v22  ;;  %v580_v11 = vmul.f32 %v577_v2, %v1126_v23 }
 0x3c4   :  { %v582_v6 = vpop.permute.xlu0 %581 }
 0x3c5   :  { %v584_v27 = vpop.permute.xlu1 %583 }
 0x3c6   :  { %v585_v59 = vsel %vm103_vm1, %v582_v6, %v584_v27  ;;  %v586_v7 = vsel %vm103_vm1, %v584_v27, %v582_v6 }
 0x3c7   :  { %v587_v12 = vmul.f32 %v586_v7, %v1116_v20  ;;  %v588_v26 = vmul.f32 %v585_v59, %v1119_v21 }
 0x3c8   :  { %v590_v14 = vpop.permute.xlu0 %589 }
 0x3c9   :  { %v796_v54 = vpack.c.bf16 %v587_v12, %v579_v8  ;;  %v592_v60 = vpop.permute.xlu1 %591  ;;  %v794_v3 = vpack.c.bf16 %v588_v26, %v580_v11 }
 0x3ca   :  { %v593_v30 = vsel %vm120_vm3, %v590_v14, %v592_v60  ;;  %v594_v29 = vsel %vm120_vm3, %v592_v60, %v590_v14 }
 0x3cb   :  { %795 = vmatprep.subr.bf16.mxu0 %v794_v3  ;;  %v595_v21 = vmul.f32 %v594_v29, %v1138_v32  ;;  %v596_v35 = vmul.f32 %v593_v30, %v1141_v33 }
 0x3cc   :  { %v598_v31 = vpop.permute.xlu0 %597  ;;  %797 = vmatpush1.bf16.msra.mxu0 %v796_v54 }
 0x3cd   :  { %v600_v22 = vpop.permute.xlu1 %599 }
 0x3ce   :  { %v601_v23 = vsel %vm137_vm0, %v598_v31, %v600_v22  ;;  %v602_v20 = vsel %vm137_vm0, %v600_v22, %v598_v31  ;;  %vm971_vm0 = vmmov 1  }
 0x3cf   :  { %v603_v36 = vmul.f32 %v602_v20, %v1104_v15  ;;  %v604_v13 = vmul.f32 %v601_v23, %v1107_v16  ;;  %vm811_vm1 = vmpackc.low %vm492_vm4, %vm971_vm0 }
 0x3d0   :  { %v606_v37 = vpop.permute.xlu0 %605 }
 0x3d1   :  { %v800_v39 = vpack.c.bf16 %v603_v36, %v595_v21  ;;  %v608_v40 = vpop.permute.xlu1 %607  ;;  %v798_v28 = vpack.c.bf16 %v604_v13, %v596_v35 }
 0x3d2   :  { %v609_v19 = vsel %vm154_vm5, %v606_v37, %v608_v40  ;;  %v610_v41 = vsel %vm154_vm5, %v608_v40, %v606_v37 }
 0x3d3   :  { %v611_v42 = vmul.f32 %v609_v19, %v1159_v50  ;;  %v612_v32 = vmul.f32 %v610_v41, %v1162_v51  ;;  %799 = vmatprep.subr.bf16.mxu0 %v798_v28 }
 0x3d4   :  { %v614_v33 = vpop.permute.xlu0 %613  ;;  %801 = vmatpush1.bf16.msra.mxu0 %v800_v39 }
 0x3d5   :  { %v804_v15 = vpack.c.bf16 %v611_v42, %v1428_v56  ;;  %v616_v16 = vpop.permute.xlu1 %615  ;;  %v802_v43 = vpack.c.bf16 %v612_v32, %v572_v57 }
 0x3d6   :  { %v617_v44 = vsel %vm171_vm7, %v614_v33, %v616_v16  ;;  %v618_v9 = vsel %vm171_vm7, %v616_v16, %v614_v33 }
 0x3d7   :  { %803 = vmatprep.subr.bf16.mxu0 %v802_v43  ;;  %v619_v4 = vmul.f32 %v617_v44, %v1190_v17  ;;  %v620_v0 = vmul.f32 %v618_v9, %v1193_v18 }
 0x3d8   :  { %v622_v45 = vpop.permute.xlu0 %621  ;;  %805 = vmatpush1.bf16.msra.mxu0 %v804_v15 }
 0x3d9   :  { %v624_v46 = vpop.permute.xlu1 %623 }
 0x3da   :  { %v625_v50 = vsel %vm188_vm6, %v622_v45, %v624_v46  ;;  %v626_v51 = vsel %vm188_vm6, %v624_v46, %v622_v45 }
 0x3db   :  { %v627_v47 = vmul.f32 %v625_v50, %v1174_v62  ;;  %v628_v38 = vmul.f32 %v626_v51, %v1177_v63 }
 0x3dc   :  { %v630_v48 = vpop.permute.xlu0 %629 }
 0x3dd   :  { %v808_v1 = vpack.c.bf16 %v627_v47, %v619_v4  ;;  %v632_v49 = vpop.permute.xlu1 %631  ;;  %v806_v52 = vpack.c.bf16 %v628_v38, %v620_v0 }
 0x3de   :  { %v633_v53 = vsel %vm205_vm8, %v630_v48, %v632_v49  ;;  %v634_v55 = vsel %vm205_vm8, %v632_v49, %v630_v48 }
 0x3df   :  { %v635_v56 = vmul.f32 %v1202_v10, %v633_v53  ;;  %v636_v17 = vmul.f32 %v1204_v34, %v634_v55  ;;  %807 = vmatprep.subr.bf16.mxu0 %v806_v52 }
 0x3e0   :  { %809 = vmatpush1.bf16.msra.mxu0 %v808_v1 }
 0x3e1   :  { %v810_v62 = vpack.c.bf16 %v970_v25, %v636_v17  ;;  %v813_v63 = vpack.c.bf16 %v970_v25, %v635_v56 }
 0x3e3   :  { %812 = vmatprep.subr.msk.bf16.mxu0 %vm811_vm1, %v810_v62 }
 0x3e4   :  { %815 = vmatpush1.bf16.msk.msra.mxu0 %vm811_vm1, %v813_v63 }
 0x3e7   :  { %749 = vmatmul.mubr.msk.f32.vlgmr.msra.gmra.mrb[4].mxu0 %vm638_vm2, %v637_v5 }
 0x4ba   :  { %v708_v18 = vpop.f32.mrb[4].mxu0 }
 0x4bb   :  { %vm713_vm3 = vcmp.gt.f32.partialorder %v708_v18, 0.0  ;;  %v715_v10 = vmul.f32 0.1, %v708_v18  ;;  %v710_v34 = vpop.f32.mrb[5].mxu0 }
 0x4bc   :  { %vm714_vm5 = vcmp.gt.f32.partialorder %v710_v34, 0.0  ;;  %v716_v57 = vmul.f32 0.1, %v710_v34 }
 0x4bd   :  { %v717_v24 = vsel %vm713_vm3, %v708_v18, %v715_v10 }
 0x4be   :  { %719 = vst [vmem:[#allocation10] sm:$0xff] %v717_v24  ;;  %v718_v25 = vsel %vm714_vm5, %v710_v34, %v716_v57 }
 0x4bf   :  { %720 = vst [vmem:[#allocation10 + $0x8] sm:$0xff] %v718_v25 }
 0x4c0   :  { %935 = shalt.err (!%p932_p8)
}
 0x4c1   :  { %s936_s0 = scalar_lea.hbm %s1526_s5, 256 }
 0x4c2   :  { %p937_p9 = scmp.ne.s32.totalorder %s1526_s5, %s936_s0  ;;  %p940_p10 = scmp.lt.u32.totalorder %s936_s0, %s1526_s5 }
 0x4c4   :  { %p942_p11 = pnand %p940_p10, %p937_p9 }
 0x4c6   :  { %945 = shalt.err (!%p942_p11)
}
 0x4c7   :  { %730 = dma.vmem_to_hbm [thread:$0]  %s728_s25, 256, %s1526_s5, [#allocation4]  }
 0x4c8   :  { %952 = dma.done.wait [#allocation4], 256  }
 0x4c9   :  { %953 = vsyncadd [#allocation4], 4294967040 }
 0x4ca   :  { %734 = vsyncpa [#allocation3], 1 }
 0x4cb   :  { %735 = vsyncpa [#allocation6], 1 }
 0x4cc   :  { %736 = vsyncpa [#allocation9], 1 }
 0x4cd   :  { %737 = vsyncpa [#allocation4], 1 }

</bundles_post_ra>
